<compile_context>
chip_gen: v7x
topology: tpu7x:2x2x1
jax: 0.10.0
libtpu: 0.0.40
codegen_flags: <defaults>
</compile_context>

<pallas_src>
import jax
import jax.numpy as jnp
from jax import lax
from jax.experimental import pallas as pl
from jax.experimental.pallas import tpu as pltpu

# ----------------------------- problem sizes -------------------------------
B = 2          # batch (number of commands)
S = 8          # sequence length (tokens per command, padded)
V = 32         # vocabulary size of the embedder
E = 32         # embedding dim
H_ENC = 32     # encoder.output_size (sentence_encoding dim)
H_MLP = 64     # MLP hidden_dim
N_OUT = 21     # MLP output_dim (number of blocks)

LANE = 128     # TPU lane width; all in-kernel feature axes are zero-padded to this
N_WEIGHTS = 4  # tw (= table @ wenc) | w1 | w2 | w3 stacked in the weight slab


# ------------------------------- the kernel --------------------------------
def language_encoder_kernel(
    tok_ref,    # VMEM [BBLK, 128] int32   token ids (cols 0..S-1), zero-padded
    meta_ref,   # VMEM [BBLK, 128] float32 col0 = length, col1 = 1/max(length,1)
    w_ref,      # VMEM [4*128, 128] f32 padded weights: tw | w1 | w2 | w3
    bias_ref,   # VMEM [8, 128]     f32 padded biases:  benc | b1 | b2 | b3 | zeros
    out_ref,    # VMEM [BBLK, 128]  f32 lane-dense logits block
):
    lane_v = lax.broadcasted_iota(jnp.int32, (1, LANE), 1)   # vocab id per lane

    tok = tok_ref[...]                    # [BBLK, 128] int32
    len_col = meta_ref[:, 0:1]            # [BBLK, 1] float length (kept float)
    inv_col = meta_ref[:, 1:2]            # [BBLK, 1] 1 / max(length, 1)

    # ---- embedding-lookup one-hot + length-masked mean pool (vectorized) ----
    # combined[b, v] = inv_len[b] * sum_{t < len_b} [token(b, t) == v]
    # S full-vreg [BBLK,128] compare/accumulate steps; no scalar loads, no
    # VMEM scratch round-trip.
    acc = jnp.zeros(tok.shape, jnp.float32)
    for t in range(S):
        onehot_t = tok[:, t:t + 1] == lane_v            # [BBLK, 128]
        valid_t = len_col > float(t)                    # [BBLK, 1] float mask
        acc = acc + jnp.logical_and(onehot_t, valid_t).astype(jnp.float32)
    combined = acc * inv_col                            # [BBLK, 128]
    # TODO(synk): out-of-vocab token ids (>= V) produce a zero embedding here,
    # whereas torch.nn.Embedding would raise an index error.

    # ---- static slab views (2 input DMAs total for all params) --------------
    tw = w_ref[0 * LANE:1 * LANE, :]      # table @ wenc, folded in the wrapper
    w1 = w_ref[1 * LANE:2 * LANE, :]
    w2 = w_ref[2 * LANE:3 * LANE, :]
    w3 = w_ref[3 * LANE:4 * LANE, :]
    b = bias_ref[...]
    benc, b1, b2, b3 = b[0:1, :], b[1:2, :], b[2:3, :], b[3:4, :]

    # ---- sentence encoding (masked mean-pool + tanh projection) -------------
    # TODO(synk): the real lang_encoder module is external; it is modeled here
    # as masked mean-pool + tanh projection of size encoder.output_size.
    sent = jnp.tanh(
        jnp.dot(combined, tw, preferred_element_type=jnp.float32) + benc)

    # ---- MLP (3 layers, ReLU; dropout p=0.2 is identity at inference) -------
    h1 = jnp.maximum(jnp.dot(sent, w1, preferred_element_type=jnp.float32) + b1, 0.0)
    h2 = jnp.maximum(jnp.dot(h1, w2, preferred_element_type=jnp.float32) + b2, 0.0)
    logits = jnp.dot(h2, w3, preferred_element_type=jnp.float32) + b3

    out_ref[...] = logits.astype(out_ref.dtype)   # dense (BBLK,128) unmasked store


# ------------------------------- the wrapper --------------------------------
def _pad2d(x, rows, cols):
    r, c = x.shape
    return jnp.pad(x.astype(jnp.float32), ((0, rows - r), (0, cols - c)))


def _choose_bblk(batch):
    # Fill MXU rows up to 128 per grid step when the batch allows (v6e/v7x),
    # minimum one full sublane group of 8. v7x's second TensorCore only helps
    # once the resulting grid has >= 2 steps.
    return max(8, min(128, ((batch + 7) // 8) * 8))


@jax.jit
def language_encoder_forward(tokens, lengths, params):
    """tokens: [B, S] int32, lengths: [B] float32 -> {'pred_block_logits': [B, 21]}."""
    b, s = tokens.shape
    assert s == S
    bblk = _choose_bblk(b)
    b_pad = ((b + bblk - 1) // bblk) * bblk

    # --- tiny VMEM inputs: tokens + (length, inv_len) per command ------------
    tok_pad = jnp.zeros((b_pad, LANE), jnp.int32).at[:b, :s].set(
        tokens.astype(jnp.int32))
    lengths_f = lengths.astype(jnp.float32)
    inv_len = 1.0 / jnp.maximum(lengths_f, 1.0)
    meta = (jnp.zeros((b_pad, LANE), jnp.float32)
            .at[:b, 0].set(lengths_f)
            .at[:b, 1].set(inv_len))

    # --- one weight slab + one bias slab (2 VMEM DMAs total) -----------------
    # Fold the (constant) embedding table into the encoder projection.
    tw = params["table"].astype(jnp.float32) @ params["wenc"].astype(jnp.float32)
    w_slab = jnp.concatenate([
        _pad2d(tw, LANE, LANE),
        _pad2d(params["w1"], LANE, LANE),
        _pad2d(params["w2"], LANE, LANE),
        _pad2d(params["w3"], LANE, LANE),
    ], axis=0)                                                # [512, 128]
    bias_slab = jnp.concatenate([
        _pad2d(params["benc"], 1, LANE),
        _pad2d(params["b1"], 1, LANE),
        _pad2d(params["b2"], 1, LANE),
        _pad2d(params["b3"], 1, LANE),
        jnp.zeros((4, LANE), jnp.float32),
    ], axis=0)                                                # [8, 128]

    out = pl.pallas_call(
        language_encoder_kernel,
        out_shape=jax.ShapeDtypeStruct((b_pad, LANE), jnp.float32),
        grid_spec=pltpu.PrefetchScalarGridSpec(
            num_scalar_prefetch=0,
            grid=(b_pad // bblk,),
            in_specs=[
                pl.BlockSpec((bblk, LANE), lambda i: (i, 0)),              # tokens
                pl.BlockSpec((bblk, LANE), lambda i: (i, 0)),              # meta
                pl.BlockSpec((N_WEIGHTS * LANE, LANE), lambda i: (0, 0)),  # weights
                pl.BlockSpec((8, LANE), lambda i: (0, 0)),                 # biases
            ],
            out_specs=pl.BlockSpec((bblk, LANE), lambda i: (i, 0)),
        ),
        compiler_params=pltpu.CompilerParams(
            dimension_semantics=("parallel",)),
    )(tok_pad, meta, w_slab, bias_slab)

    # lane-dense kernel output -> logical [B, 21] slice (plain XLA glue)
    return {"pred_block_logits": out[:b, :N_OUT]}


# --------------------------- deterministic params ---------------------------
def init_params(key):
    ks = jax.random.split(key, 8)

    def dense(k, fan_in, fan_out):
        scale = 1.0 / jnp.sqrt(jnp.float32(fan_in))
        return jax.random.uniform(k, (fan_in, fan_out), jnp.float32, -scale, scale)

    return {
        "table": jax.random.normal(ks[0], (V, E), jnp.float32) * 0.02,
        "wenc": dense(ks[1], E, H_ENC),
        "benc": jnp.zeros((1, H_ENC), jnp.float32),
        "w1": dense(ks[2], H_ENC, H_MLP),
        "b1": jnp.zeros((1, H_MLP), jnp.float32),
        "w2": dense(ks[3], H_MLP, H_MLP),
        "b2": jnp.zeros((1, H_MLP), jnp.float32),
        "w3": dense(ks[4], H_MLP, N_OUT),
        "b3": jnp.zeros((1, N_OUT), jnp.float32),
    }


# ------------------------------ pure-JAX reference ---------------------------
def reference_forward(tokens, lengths, params):
    emb = params["table"][tokens]                              # [B,S,E]
    t = jnp.arange(S)[None, :].astype(jnp.float32)
    mask = (t < lengths[:, None]).astype(jnp.float32)          # [B,S]
    denom = jnp.maximum(lengths[:, None], 1.0)
    pooled = (emb * mask[..., None]).sum(axis=1) / denom       # [B,E]
    sent = jnp.tanh(pooled @ params["wenc"] + params["benc"])
    h1 = jnp.maximum(sent @ params["w1"] + params["b1"], 0.0)
    h2 = jnp.maximum(h1 @ params["w2"] + params["b2"], 0.0)
    return h2 @ params["w3"] + params["b3"]


if __name__ == "__main__":
    key = jax.random.PRNGKey(0)
    k_tok, k_par = jax.random.split(key)

    # data_batch = {'command': tokens, 'length': lengths}
    tokens = jax.random.randint(k_tok, (B, S), 0, V, dtype=jnp.int32)
    lengths = jnp.array([8.0, 5.0], dtype=jnp.float32)   # valid tokens per command

    params = init_params(k_par)

    out = language_encoder_forward(tokens, lengths, params)
    logits = jax.block_until_ready(out["pred_block_logits"])

    ref = reference_forward(tokens, lengths, params)
    assert logits.shape == (B, N_OUT), logits.shape
    assert bool(jnp.all(jnp.isfinite(logits)))
    assert float(jnp.max(jnp.abs(logits - ref))) < 1e-3, float(jnp.max(jnp.abs(logits - ref)))
    print("KERNEL_OK")
</pallas_src>

<mosaic_0001>
module attributes {stable_mosaic.version = 11 : i64} {
  func.func @language_encoder_kernel(%arg0: i32, %arg1: memref<8x128xi32, #tpu.memory_space<vmem>>, %arg2: memref<8x128xf32, #tpu.memory_space<vmem>>, %arg3: memref<512x128xf32, #tpu.memory_space<vmem>>, %arg4: memref<8x128xf32, #tpu.memory_space<vmem>>, %arg5: memref<8x128xf32, #tpu.memory_space<vmem>>) attributes {dimension_semantics = [#tpu.dimension_semantics<parallel>], iteration_bounds = array<i64: 1>, scalar_prefetch = 0 : i64, scratch_operands = 0 : i64, tpu.core_type = #tpu.core_type<tc>, window_params = [{transform_indices = @transform_0, window_bounds = array<i64: 8, 128>}, {transform_indices = @transform_1, window_bounds = array<i64: 8, 128>}, {pipeline_mode = #tpu.pipeline_mode<synchronous>, transform_indices = @transform_2, window_bounds = array<i64: 512, 128>}, {pipeline_mode = #tpu.pipeline_mode<synchronous>, transform_indices = @transform_3, window_bounds = array<i64: 8, 128>}, {transform_indices = @transform_4, window_bounds = array<i64: 8, 128>}]} {
    %0 = tpu.iota {dimensions = array<i32: 1>} : vector<1x128xi32>
    %c0 = arith.constant 0 : index
    %c0_0 = arith.constant 0 : index
    %1 = vector.load %arg1[%c0, %c0_0] : memref<8x128xi32, #tpu.memory_space<vmem>>, vector<8x128xi32>
    %c0_1 = arith.constant 0 : index
    %c0_2 = arith.constant 0 : index
    %2 = vector.load %arg2[%c0_1, %c0_2] : memref<8x128xf32, #tpu.memory_space<vmem>>, vector<8x1xf32>
    %c0_3 = arith.constant 0 : index
    %c1 = arith.constant 1 : index
    %3 = vector.load %arg2[%c0_3, %c1] : memref<8x128xf32, #tpu.memory_space<vmem>>, vector<8x1xf32>
    %cst = arith.constant 0.000000e+00 : f32
    %4 = vector.broadcast %cst : f32 to vector<8x128xf32>
    %5 = vector.extract_strided_slice %1 {offsets = [0, 0], sizes = [8, 1], strides = [1, 1]} : vector<8x128xi32> to vector<8x1xi32>
    %6 = vector.broadcast %5 : vector<8x1xi32> to vector<8x128xi32>
    %7 = vector.broadcast %0 : vector<1x128xi32> to vector<8x128xi32>
    %8 = arith.cmpi eq, %6, %7 : vector<8x128xi32>
    %cst_4 = arith.constant 0.000000e+00 : f32
    %9 = vector.broadcast %cst_4 : f32 to vector<8x1xf32>
    %10 = arith.cmpf ogt, %2, %9 : vector<8x1xf32>
    %11 = vector.broadcast %10 : vector<8x1xi1> to vector<8x128xi1>
    %12 = arith.andi %8, %11 : vector<8x128xi1>
    %13 = arith.extui %12 : vector<8x128xi1> to vector<8x128xi32>
    %14 = arith.sitofp %13 : vector<8x128xi32> to vector<8x128xf32>
    %15 = arith.addf %4, %14 : vector<8x128xf32>
    %16 = vector.extract_strided_slice %1 {offsets = [0, 1], sizes = [8, 1], strides = [1, 1]} : vector<8x128xi32> to vector<8x1xi32>
    %17 = vector.broadcast %16 : vector<8x1xi32> to vector<8x128xi32>
    %18 = vector.broadcast %0 : vector<1x128xi32> to vector<8x128xi32>
    %19 = arith.cmpi eq, %17, %18 : vector<8x128xi32>
    %cst_5 = arith.constant 1.000000e+00 : f32
    %20 = vector.broadcast %cst_5 : f32 to vector<8x1xf32>
    %21 = arith.cmpf ogt, %2, %20 : vector<8x1xf32>
    %22 = vector.broadcast %21 : vector<8x1xi1> to vector<8x128xi1>
    %23 = arith.andi %19, %22 : vector<8x128xi1>
    %24 = arith.extui %23 : vector<8x128xi1> to vector<8x128xi32>
    %25 = arith.sitofp %24 : vector<8x128xi32> to vector<8x128xf32>
    %26 = arith.addf %15, %25 : vector<8x128xf32>
    %27 = vector.extract_strided_slice %1 {offsets = [0, 2], sizes = [8, 1], strides = [1, 1]} : vector<8x128xi32> to vector<8x1xi32>
    %28 = vector.broadcast %27 : vector<8x1xi32> to vector<8x128xi32>
    %29 = vector.broadcast %0 : vector<1x128xi32> to vector<8x128xi32>
    %30 = arith.cmpi eq, %28, %29 : vector<8x128xi32>
    %cst_6 = arith.constant 2.000000e+00 : f32
    %31 = vector.broadcast %cst_6 : f32 to vector<8x1xf32>
    %32 = arith.cmpf ogt, %2, %31 : vector<8x1xf32>
    %33 = vector.broadcast %32 : vector<8x1xi1> to vector<8x128xi1>
    %34 = arith.andi %30, %33 : vector<8x128xi1>
    %35 = arith.extui %34 : vector<8x128xi1> to vector<8x128xi32>
    %36 = arith.sitofp %35 : vector<8x128xi32> to vector<8x128xf32>
    %37 = arith.addf %26, %36 : vector<8x128xf32>
    %38 = vector.extract_strided_slice %1 {offsets = [0, 3], sizes = [8, 1], strides = [1, 1]} : vector<8x128xi32> to vector<8x1xi32>
    %39 = vector.broadcast %38 : vector<8x1xi32> to vector<8x128xi32>
    %40 = vector.broadcast %0 : vector<1x128xi32> to vector<8x128xi32>
    %41 = arith.cmpi eq, %39, %40 : vector<8x128xi32>
    %cst_7 = arith.constant 3.000000e+00 : f32
    %42 = vector.broadcast %cst_7 : f32 to vector<8x1xf32>
    %43 = arith.cmpf ogt, %2, %42 : vector<8x1xf32>
    %44 = vector.broadcast %43 : vector<8x1xi1> to vector<8x128xi1>
    %45 = arith.andi %41, %44 : vector<8x128xi1>
    %46 = arith.extui %45 : vector<8x128xi1> to vector<8x128xi32>
    %47 = arith.sitofp %46 : vector<8x128xi32> to vector<8x128xf32>
    %48 = arith.addf %37, %47 : vector<8x128xf32>
    %49 = vector.extract_strided_slice %1 {offsets = [0, 4], sizes = [8, 1], strides = [1, 1]} : vector<8x128xi32> to vector<8x1xi32>
    %50 = vector.broadcast %49 : vector<8x1xi32> to vector<8x128xi32>
    %51 = vector.broadcast %0 : vector<1x128xi32> to vector<8x128xi32>
    %52 = arith.cmpi eq, %50, %51 : vector<8x128xi32>
    %cst_8 = arith.constant 4.000000e+00 : f32
    %53 = vector.broadcast %cst_8 : f32 to vector<8x1xf32>
    %54 = arith.cmpf ogt, %2, %53 : vector<8x1xf32>
    %55 = vector.broadcast %54 : vector<8x1xi1> to vector<8x128xi1>
    %56 = arith.andi %52, %55 : vector<8x128xi1>
    %57 = arith.extui %56 : vector<8x128xi1> to vector<8x128xi32>
    %58 = arith.sitofp %57 : vector<8x128xi32> to vector<8x128xf32>
    %59 = arith.addf %48, %58 : vector<8x128xf32>
    %60 = vector.extract_strided_slice %1 {offsets = [0, 5], sizes = [8, 1], strides = [1, 1]} : vector<8x128xi32> to vector<8x1xi32>
    %61 = vector.broadcast %60 : vector<8x1xi32> to vector<8x128xi32>
    %62 = vector.broadcast %0 : vector<1x128xi32> to vector<8x128xi32>
    %63 = arith.cmpi eq, %61, %62 : vector<8x128xi32>
    %cst_9 = arith.constant 5.000000e+00 : f32
    %64 = vector.broadcast %cst_9 : f32 to vector<8x1xf32>
    %65 = arith.cmpf ogt, %2, %64 : vector<8x1xf32>
    %66 = vector.broadcast %65 : vector<8x1xi1> to vector<8x128xi1>
    %67 = arith.andi %63, %66 : vector<8x128xi1>
    %68 = arith.extui %67 : vector<8x128xi1> to vector<8x128xi32>
    %69 = arith.sitofp %68 : vector<8x128xi32> to vector<8x128xf32>
    %70 = arith.addf %59, %69 : vector<8x128xf32>
    %71 = vector.extract_strided_slice %1 {offsets = [0, 6], sizes = [8, 1], strides = [1, 1]} : vector<8x128xi32> to vector<8x1xi32>
    %72 = vector.broadcast %71 : vector<8x1xi32> to vector<8x128xi32>
    %73 = vector.broadcast %0 : vector<1x128xi32> to vector<8x128xi32>
    %74 = arith.cmpi eq, %72, %73 : vector<8x128xi32>
    %cst_10 = arith.constant 6.000000e+00 : f32
    %75 = vector.broadcast %cst_10 : f32 to vector<8x1xf32>
    %76 = arith.cmpf ogt, %2, %75 : vector<8x1xf32>
    %77 = vector.broadcast %76 : vector<8x1xi1> to vector<8x128xi1>
    %78 = arith.andi %74, %77 : vector<8x128xi1>
    %79 = arith.extui %78 : vector<8x128xi1> to vector<8x128xi32>
    %80 = arith.sitofp %79 : vector<8x128xi32> to vector<8x128xf32>
    %81 = arith.addf %70, %80 : vector<8x128xf32>
    %82 = vector.extract_strided_slice %1 {offsets = [0, 7], sizes = [8, 1], strides = [1, 1]} : vector<8x128xi32> to vector<8x1xi32>
    %83 = vector.broadcast %82 : vector<8x1xi32> to vector<8x128xi32>
    %84 = vector.broadcast %0 : vector<1x128xi32> to vector<8x128xi32>
    %85 = arith.cmpi eq, %83, %84 : vector<8x128xi32>
    %cst_11 = arith.constant 7.000000e+00 : f32
    %86 = vector.broadcast %cst_11 : f32 to vector<8x1xf32>
    %87 = arith.cmpf ogt, %2, %86 : vector<8x1xf32>
    %88 = vector.broadcast %87 : vector<8x1xi1> to vector<8x128xi1>
    %89 = arith.andi %85, %88 : vector<8x128xi1>
    %90 = arith.extui %89 : vector<8x128xi1> to vector<8x128xi32>
    %91 = arith.sitofp %90 : vector<8x128xi32> to vector<8x128xf32>
    %92 = arith.addf %81, %91 : vector<8x128xf32>
    %93 = vector.broadcast %3 : vector<8x1xf32> to vector<8x128xf32>
    %94 = arith.mulf %92, %93 : vector<8x128xf32>
    %c0_12 = arith.constant 0 : index
    %c0_13 = arith.constant 0 : index
    %95 = vector.load %arg3[%c0_12, %c0_13] : memref<512x128xf32, #tpu.memory_space<vmem>>, vector<128x128xf32>
    %c128 = arith.constant 128 : index
    %c0_14 = arith.constant 0 : index
    %96 = vector.load %arg3[%c128, %c0_14] : memref<512x128xf32, #tpu.memory_space<vmem>>, vector<128x128xf32>
    %c256 = arith.constant 256 : index
    %c0_15 = arith.constant 0 : index
    %97 = vector.load %arg3[%c256, %c0_15] : memref<512x128xf32, #tpu.memory_space<vmem>>, vector<128x128xf32>
    %c384 = arith.constant 384 : index
    %c0_16 = arith.constant 0 : index
    %98 = vector.load %arg3[%c384, %c0_16] : memref<512x128xf32, #tpu.memory_space<vmem>>, vector<128x128xf32>
    %c0_17 = arith.constant 0 : index
    %c0_18 = arith.constant 0 : index
    %99 = vector.load %arg4[%c0_17, %c0_18] : memref<8x128xf32, #tpu.memory_space<vmem>>, vector<8x128xf32>
    %100 = vector.extract_strided_slice %99 {offsets = [0, 0], sizes = [1, 128], strides = [1, 1]} : vector<8x128xf32> to vector<1x128xf32>
    %101 = vector.extract_strided_slice %99 {offsets = [1, 0], sizes = [1, 128], strides = [1, 1]} : vector<8x128xf32> to vector<1x128xf32>
    %102 = vector.extract_strided_slice %99 {offsets = [2, 0], sizes = [1, 128], strides = [1, 1]} : vector<8x128xf32> to vector<1x128xf32>
    %103 = vector.extract_strided_slice %99 {offsets = [3, 0], sizes = [1, 128], strides = [1, 1]} : vector<8x128xf32> to vector<1x128xf32>
    %cst_19 = arith.constant dense<0.000000e+00> : vector<8x128xf32>
    %104 = tpu.matmul %94, %95, %cst_19 {dimension_numbers = #tpu.dot_dimension_numbers<[1], [0], [0], [1], [0, 0, 1, 1], [], []>} : vector<8x128xf32>, vector<128x128xf32>, vector<8x128xf32> -> vector<8x128xf32>
    %105 = vector.broadcast %100 : vector<1x128xf32> to vector<8x128xf32>
    %106 = arith.addf %104, %105 : vector<8x128xf32>
    %107 = math.tanh %106 : vector<8x128xf32>
    %cst_20 = arith.constant dense<0.000000e+00> : vector<8x128xf32>
    %108 = tpu.matmul %107, %96, %cst_20 {dimension_numbers = #tpu.dot_dimension_numbers<[1], [0], [0], [1], [0, 0, 1, 1], [], []>} : vector<8x128xf32>, vector<128x128xf32>, vector<8x128xf32> -> vector<8x128xf32>
    %109 = vector.broadcast %101 : vector<1x128xf32> to vector<8x128xf32>
    %110 = arith.addf %108, %109 : vector<8x128xf32>
    %cst_21 = arith.constant 0.000000e+00 : f32
    %111 = vector.broadcast %cst_21 : f32 to vector<8x128xf32>
    %112 = arith.maximumf %110, %111 : vector<8x128xf32>
    %cst_22 = arith.constant dense<0.000000e+00> : vector<8x128xf32>
    %113 = tpu.matmul %112, %97, %cst_22 {dimension_numbers = #tpu.dot_dimension_numbers<[1], [0], [0], [1], [0, 0, 1, 1], [], []>} : vector<8x128xf32>, vector<128x128xf32>, vector<8x128xf32> -> vector<8x128xf32>
    %114 = vector.broadcast %102 : vector<1x128xf32> to vector<8x128xf32>
    %115 = arith.addf %113, %114 : vector<8x128xf32>
    %cst_23 = arith.constant 0.000000e+00 : f32
    %116 = vector.broadcast %cst_23 : f32 to vector<8x128xf32>
    %117 = arith.maximumf %115, %116 : vector<8x128xf32>
    %cst_24 = arith.constant dense<0.000000e+00> : vector<8x128xf32>
    %118 = tpu.matmul %117, %98, %cst_24 {dimension_numbers = #tpu.dot_dimension_numbers<[1], [0], [0], [1], [0, 0, 1, 1], [], []>} : vector<8x128xf32>, vector<128x128xf32>, vector<8x128xf32> -> vector<8x128xf32>
    %119 = vector.broadcast %103 : vector<1x128xf32> to vector<8x128xf32>
    %120 = arith.addf %118, %119 : vector<8x128xf32>
    %c0_25 = arith.constant 0 : index
    %c0_26 = arith.constant 0 : index
    %121 = vector.load %arg5[%c0_25, %c0_26] : memref<8x128xf32, #tpu.memory_space<vmem>>, vector<8x128xf32>
    tpu.vector_store %arg5[%c0_25, %c0_26], %120 {strides = array<i32>} : memref<8x128xf32, #tpu.memory_space<vmem>>, vector<8x128xf32>,
    return
  }
  func.func @transform_0(%arg0: i32) -> (i32, i32) {
    %c0_i32 = arith.constant 0 : i32
    %c0_i32_0 = arith.constant 0 : i32
    return %arg0, %c0_i32 : i32, i32
  }
  func.func @transform_1(%arg0: i32) -> (i32, i32) {
    %c0_i32 = arith.constant 0 : i32
    %c0_i32_0 = arith.constant 0 : i32
    return %arg0, %c0_i32 : i32, i32
  }
  func.func @transform_2(%arg0: i32) -> (i32, i32) {
    %c0_i32 = arith.constant 0 : i32
    %c0_i32_0 = arith.constant 0 : i32
    %c0_i32_1 = arith.constant 0 : i32
    return %c0_i32, %c0_i32_0 : i32, i32
  }
  func.func @transform_3(%arg0: i32) -> (i32, i32) {
    %c0_i32 = arith.constant 0 : i32
    %c0_i32_0 = arith.constant 0 : i32
    %c0_i32_1 = arith.constant 0 : i32
    return %c0_i32, %c0_i32_0 : i32, i32
  }
  func.func @transform_4(%arg0: i32) -> (i32, i32) {
    %c0_i32 = arith.constant 0 : i32
    %c0_i32_0 = arith.constant 0 : i32
    return %arg0, %c0_i32 : i32, i32
  }
}

</mosaic_0001>

<bundles_post_ra>
// kernel: language_encoder_forward.1
= control target key start
LH: loop header
LB: loop body
LE: loop exit
PB: predicated region body
PF: predicated region fallthrough
CT: control target
= control target key end

     0   :  { %v846_v0 = vmov 2   ;;  %v847_v1 = vmov 1   ;;  %v848_v4 = vmov 0   ;;  %v849_v9 = vmov 3   ;;  %s1182_s0 = inlined_call_operand.vmem [shape: s32[8,128], index: 0, kind: input, shape index: {}]   ;;  %s1183_s1 = inlined_call_operand.vmem [shape: f32[8,128], index: 1, kind: input, shape index: {}]   ;;  %s1184_s2 = inlined_call_operand.vmem [shape: f32[512,128], index: 2, kind: input, shape index: {}]   ;;  %s1185_s3 = inlined_call_operand.vmem [shape: f32[8,128], index: 3, kind: input, shape index: {}]   ;;  %s1186_s4 = inlined_call_operand.vmem [shape: f32[8,128], index: 4, kind: output, shape index: {}]  }
   0x1   :  { %832 = vset.pattern.permute.xlu0 %v846_v0  ;;  %831 = vset.pattern.permute.xlu1 %v847_v1  ;;  %v885_v2 = vld [vmem:[%s1182_s0] sm:$0xff]  ;;  %v850_v10 = vmov 5   ;;  %v140_v12 = vld [vmem:[%s1184_s2 + $0x8] sm:$0xff]  ;;  %v851_v13 = vmov 4   ;;  %v852_v15 = vmov 0.0|0.0   ;;  %v141_v16 = vld [vmem:[%s1184_s2 + $0x10] sm:$0xff] }
   0x2   :  { %v890_v3 = vld [vmem:[%s1183_s1] sm:$0xff]  ;;  %50 = vperm.xlu0 %832, %v885_v2   ;;  %36 = vperm.xlu1 %831, %v885_v2   ;;  %v142_v17 = vld [vmem:[%s1184_s2 + $0x18] sm:$0xff]  ;;  %v144_v23 = vld [vmem:[%s1184_s2 + $0x28] sm:$0xff]  ;;  %v853_v28 = vmov 6   ;;  %v854_v32 = vmov 7   ;;  %vm855_vm8 = vmmov 0  }
   0x3   :  { %vm39_vm0 = vcmp.gt.f32.partialorder %v890_v3, 1.0  ;;  %vm25_vm1 = vcmp.gt.f32.partialorder %v890_v3, 0.0  ;;  %vm53_vm2 = vcmp.gt.f32.partialorder %v890_v3, 2.0  ;;  %vm67_vm3 = vcmp.gt.f32.partialorder %v890_v3, 3.0  ;;  %v139_v11 = vld [vmem:[%s1184_s2] sm:$0xff]  ;;  %724 = vmatprep.subr.bf16.mxu0 %v852_v15  ;;  %748 = vmatprep.subr.bf16.mxu1 %v852_v15  ;;  %v145_v25 = vld [vmem:[%s1184_s2 + $0x30] sm:$0xff] }
   0x4   :  { %v40_v5 = vsel %vm39_vm0, 1, %v848_v4  ;;  %v26_v6 = vsel %vm25_vm1, 1, %v848_v4  ;;  %v54_v7 = vsel %vm53_vm2, 1, %v848_v4  ;;  %v68_v8 = vsel %vm67_vm3, 1, %v848_v4  ;;  %v143_v22 = vld [vmem:[%s1184_s2 + $0x20] sm:$0xff]  ;;  %v146_v26 = vld [vmem:[%s1184_s2 + $0x38] sm:$0xff] }
   0x5   :  { %vm109_vm4 = vcmp.gt.f32.partialorder %v890_v3, 6.0  ;;  %vm81_vm5 = vcmp.gt.f32.partialorder %v890_v3, 4.0  ;;  %v725_v14 = vpack.c.bf16 %v140_v12, %v139_v11  ;;  %v728_v19 = vpack.c.bf16 %v142_v17, %v141_v16  ;;  %v147_v29 = vld [vmem:[%s1184_s2 + $0x40] sm:$0xff]  ;;  %v148_v30 = vld [vmem:[%s1184_s2 + $0x48] sm:$0xff]  ;;  %v149_v33 = vld [vmem:[%s1184_s2 + $0x50] sm:$0xff] }
   0x6   :  { %833 = vset.pattern.permute.xlu0 %v848_v4  ;;  %834 = vset.pattern.permute.xlu1 %v848_v4  ;;  %v110_v18 = vsel %vm109_vm4, 1, %v848_v4  ;;  %v82_v20 = vsel %vm81_vm5, 1, %v848_v4  ;;  %vm95_vm6 = vcmp.gt.f32.partialorder %v890_v3, 5.0  ;;  %v731_v24 = vpack.c.bf16 %v144_v23, %v143_v22  ;;  %v150_v34 = vld [vmem:[%s1184_s2 + $0x58] sm:$0xff]  ;;  %v151_v37 = vld [vmem:[%s1184_s2 + $0x60] sm:$0xff]  ;;  %v152_v38 = vld [vmem:[%s1184_s2 + $0x68] sm:$0xff] }
   0x7   :  { %22 = vperm.xlu0 %833, %v885_v2   ;;  %42 = vperm.xlu1 %834, %v40_v5   ;;  %v96_v21 = vsel %vm95_vm6, 1, %v848_v4  ;;  %v734_v27 = vpack.c.bf16 %v146_v26, %v145_v25  ;;  %v737_v31 = vpack.c.bf16 %v148_v30, %v147_v29  ;;  %vm123_vm7 = vcmp.gt.f32.partialorder %v890_v3, 7.0  ;;  %v153_v40 = vld [vmem:[%s1184_s2 + $0x70] sm:$0xff]  ;;  %v154_v41 = vld [vmem:[%s1184_s2 + $0x78] sm:$0xff]  ;;  %v155_v44 = vld [vmem:[%s1184_s2 + $0x80] sm:$0xff] }
   0x8   :  { %726 = vmatpush3.bf16.msra.mxu0 %v725_v14  ;;  %v740_v35 = vpack.c.bf16 %v150_v34, %v149_v33  ;;  %v124_v36 = vsel %vm123_vm7, 1, %v848_v4  ;;  %v743_v39 = vpack.c.bf16 %v152_v38, %v151_v37  ;;  %v746_v42 = vpack.c.bf16 %v154_v41, %v153_v40  ;;  %v156_v45 = vld [vmem:[%s1184_s2 + $0x88] sm:$0xff]  ;;  %v157_v46 = vld [vmem:[%s1184_s2 + $0x90] sm:$0xff]  ;;  %v158_v48 = vld [vmem:[%s1184_s2 + $0x98] sm:$0xff] }
   0x9   :  { %727 = vmatprep.subr.bf16.mxu0 %v852_v15  ;;  %v856_v43 = vmov 0.0   ;;  %v749_v47 = vpack.c.bf16 %v156_v45, %v155_v44  ;;  %v752_v49 = vpack.c.bf16 %v158_v48, %v157_v46  ;;  %v159_v50 = vld [vmem:[%s1184_s2 + $0xa0] sm:$0xff]  ;;  %v160_v51 = vld [vmem:[%s1184_s2 + $0xa8] sm:$0xff]  ;;  %v161_v53 = vld [vmem:[%s1184_s2 + $0xb0] sm:$0xff] }
   0xa   :  { %616 = vmatprep.mubr.msk.f32.mxu0 %vm855_vm8, %v856_v43  ;;  %651 = vmatprep.mubr.msk.f32.mxu1 %vm855_vm8, %v856_v43  ;;  %v755_v52 = vpack.c.bf16 %v160_v51, %v159_v50  ;;  %v162_v54 = vld [vmem:[%s1184_s2 + $0xb8] sm:$0xff]  ;;  %v163_v56 = vld [vmem:[%s1184_s2 + $0xc0] sm:$0xff]  ;;  %v164_v57 = vld [vmem:[%s1184_s2 + $0xc8] sm:$0xff] }
   0xb   :  { %28 = vperm.xlu0 %833, %v26_v6   ;;  %56 = vperm.xlu1 %834, %v54_v7   ;;  %v758_v55 = vpack.c.bf16 %v162_v54, %v161_v53  ;;  %v761_v58 = vpack.c.bf16 %v164_v57, %v163_v56  ;;  %v167_v34 = vld [vmem:[%s1184_s2 + $0xe0] sm:$0xff]  ;;  %v169_v37 = vld [vmem:[%s1184_s2 + $0xf0] sm:$0xff]  ;;  %v170_v38 = vld [vmem:[%s1184_s2 + $0xf8] sm:$0xff] }
   0xc   :  { %729 = vmatpush3.bf16.msra.mxu0 %v728_v19  ;;  %750 = vmatpush3.bf16.msra.mxu1 %v749_v47  ;;  %v171_v40 = vld [vmem:[%s1184_s2 + $0x100] sm:$0xff]  ;;  %v172_v41 = vld [vmem:[%s1184_s2 + $0x108] sm:$0xff]  ;;  %v174_v45 = vld [vmem:[%s1184_s2 + $0x118] sm:$0xff] }
   0xd   :  { %730 = vmatprep.subr.bf16.mxu0 %v852_v15  ;;  %751 = vmatprep.subr.bf16.mxu1 %v852_v15  ;;  %v773_v44 = vpack.c.bf16 %v172_v41, %v171_v40  ;;  %v175_v47 = vld [vmem:[%s1184_s2 + $0x120] sm:$0xff]  ;;  %v176_v48 = vld [vmem:[%s1184_s2 + $0x128] sm:$0xff]  ;;  %v177_v50 = vld [vmem:[%s1184_s2 + $0x130] sm:$0xff] }
   0xe   :  { %v178_v51 = vld [vmem:[%s1184_s2 + $0x138] sm:$0xff]  ;;  %v179_v53 = vld [vmem:[%s1184_s2 + $0x140] sm:$0xff]  ;;  %v180_v54 = vld [vmem:[%s1184_s2 + $0x148] sm:$0xff] }
   0xf   :  { %835 = vset.pattern.permute.xlu1 %v849_v9  ;;  %70 = vperm.xlu0 %833, %v68_v8   ;;  %v181_v56 = vld [vmem:[%s1184_s2 + $0x150] sm:$0xff]  ;;  %v182_v57 = vld [vmem:[%s1184_s2 + $0x158] sm:$0xff] }
  0x10   :  { %64 = vperm.xlu1 %835, %v885_v2   ;;  %732 = vmatpush3.bf16.msra.mxu0 %v731_v24 }
  0x11   :  { %733 = vmatprep.subr.bf16.mxu0 %v852_v15  ;;  %753 = vmatpush3.bf16.msra.mxu1 %v752_v49  ;;  %v779_v49 = vpack.c.bf16 %v176_v48, %v175_v47 }
  0x12   :  { %754 = vmatprep.subr.bf16.mxu1 %v852_v15 }
  0x13   :  { %838 = vset.pattern.permute.xlu0 %v850_v10 }
  0x14   :  { %836 = vset.pattern.permute.xlu1 %v851_v13  ;;  %92 = vperm.xlu0 %838, %v885_v2  }
  0x15   :  { %78 = vperm.xlu1 %836, %v885_v2   ;;  %735 = vmatpush3.bf16.msra.mxu0 %v734_v27 }
  0x16   :  { %736 = vmatprep.subr.bf16.mxu0 %v852_v15  ;;  %756 = vmatpush3.bf16.msra.mxu1 %v755_v52  ;;  %v782_v52 = vpack.c.bf16 %v178_v51, %v177_v50 }
  0x17   :  { %757 = vmatprep.subr.bf16.mxu1 %v852_v15 }
  0x18   :  { %840 = vset.pattern.permute.xlu0 %v848_v4 }
  0x19   :  { %837 = vset.pattern.permute.xlu1 %v848_v4  ;;  %112 = vperm.xlu0 %840, %v110_v18  }
  0x1a   :  { %84 = vperm.xlu1 %837, %v82_v20   ;;  %738 = vmatpush3.bf16.msra.mxu0 %v737_v31  ;;  %v165_v31 = vld [vmem:[%s1184_s2 + $0xd0] sm:$0xff] }
  0x1b   :  { %739 = vmatprep.subr.bf16.mxu0 %v852_v15  ;;  %759 = vmatpush3.bf16.msra.mxu1 %v758_v55  ;;  %v785_v55 = vpack.c.bf16 %v180_v54, %v179_v53 }
  0x1c   :  { %760 = vmatprep.subr.bf16.mxu1 %v852_v15 }
  0x1d   :  { %843 = vset.pattern.permute.xlu0 %v847_v1  ;;  %v17_v1 = vlaneseq }
  0x1e   :  { %98 = vperm.xlu1 %837, %v96_v21   ;;  %135 = vperm.xlu0 %843, %v890_v3  }
  0x1f   :  { %741 = vmatpush3.bf16.msra.mxu0 %v740_v35  ;;  %762 = vmatpush3.bf16.msra.mxu1 %v761_v58  ;;  %v168_v35 = vld [vmem:[%s1184_s2 + $0xe8] sm:$0xff]  ;;  %v788_v58 = vpack.c.bf16 %v182_v57, %v181_v56 }
  0x20   :  { %742 = vmatprep.subr.bf16.mxu0 %v852_v15  ;;  %763 = vmatprep.subr.bf16.mxu1 %v852_v15 }
  0x22   :  { %839 = vset.pattern.permute.xlu1 %v853_v28 }
  0x23   :  { %106 = vperm.xlu1 %839, %v885_v2   ;;  %744 = vmatpush3.bf16.msra.mxu0 %v743_v39  ;;  %v770_v39 = vpack.c.bf16 %v170_v38, %v169_v37  ;;  %v202_v37 = vld [vmem:[%s1184_s2 + $0x1f8] sm:$0xff] }
  0x24   :  { %745 = vmatprep.subr.bf16.mxu0 %v852_v15 }
  0x27   :  { %841 = vset.pattern.permute.xlu1 %v854_v32  ;;  %747 = vmatpush3.bf16.msra.mxu0 %v746_v42  ;;  %v166_v32 = vld [vmem:[%s1184_s2 + $0xd8] sm:$0xff]  ;;  %v173_v42 = vld [vmem:[%s1184_s2 + $0x110] sm:$0xff] }
  0x28   :  { %120 = vperm.xlu1 %841, %v885_v2   ;;  %772 = vmatprep.subr.bf16.mxu0 %v852_v15  ;;  %v764_v33 = vpack.c.bf16 %v166_v32, %v165_v31  ;;  %v776_v46 = vpack.c.bf16 %v174_v45, %v173_v42 }
  0x2a   :  { %765 = vmatpush3.bf16.msra.mxu1 %v764_v33 }
  0x2b   :  { %766 = vmatprep.subr.bf16.mxu1 %v852_v15 }
  0x2c   :  { %842 = vset.pattern.permute.xlu1 %v848_v4  ;;  %v18_v4 = vand.u32 127, %v17_v1 }
  0x2d   :  { %126 = vperm.xlu1 %842, %v124_v36   ;;  %v767_v36 = vpack.c.bf16 %v168_v35, %v167_v34 }
  0x2f   :  { %768 = vmatpush3.bf16.msra.mxu1 %v767_v36  ;;  %v201_v36 = vld [vmem:[%s1184_s2 + $0x1f0] sm:$0xff] }
  0x30   :  { %769 = vmatprep.subr.bf16.mxu1 %v852_v15  ;;  %v818_v38 = vpack.c.bf16 %v202_v37, %v201_v36 }
  0x33   :  { %771 = vmatpush3.bf16.msra.mxu1 %v770_v39 }
  0x34   :  { %796 = vmatprep.subr.bf16.mxu1 %v852_v15 }
  0x81   :  { %v37_v59 = vpop.permute.xlu1 %36  ;;  %v51_v60 = vpop.permute.xlu0 %50 }
  0x82   :  { %vm38_vm13 = vcmp.eq.s32.totalorder %v37_v59, %v18_v4  ;;  %vm52_vm15 = vcmp.eq.s32.totalorder %v51_v60, %v18_v4  ;;  %v183_v59 = vld [vmem:[%s1184_s2 + $0x160] sm:$0xff]  ;;  %v184_v60 = vld [vmem:[%s1184_s2 + $0x168] sm:$0xff] }
  0x86   :  { %v43_v61 = vpop.permute.xlu1 %42  ;;  %v23_v63 = vpop.permute.xlu0 %22 }
  0x87   :  { %vm24_vm9 = vcmp.eq.s32.totalorder %v23_v63, %v18_v4  ;;  %vm44_vm11 = vcmp.eq.s32.totalorder %v43_v61, 1  ;;  %v791_v61 = vpack.c.bf16 %v184_v60, %v183_v59 }
  0x88   :  { %vm45_vm14 = vmand %vm38_vm13, %vm44_vm11 }
  0x89   :  { %v509_v10 = vsel %vm45_vm14, 1.0, %v856_v43 }
  0x8a   :  { %v57_v62 = vpop.permute.xlu1 %56  ;;  %v29_v2 = vpop.permute.xlu0 %28 }
  0x8b   :  { %vm30_vm10 = vcmp.eq.s32.totalorder %v29_v2, 1  ;;  %vm58_vm0 = vcmp.eq.s32.totalorder %v57_v62, 1  ;;  %v1101_v62 = vshrl.u32 %v17_v1, 7  ;;  %v185_v1 = vld [vmem:[%s1184_s2 + $0x170] sm:$0xff] }
  0x8c   :  { %vm31_vm12 = vmand %vm24_vm9, %vm30_vm10 }
  0x8d   :  { %v508_v8 = vsel %vm31_vm12, 1.0, %v856_v43  ;;  %vm59_vm3 = vmand %vm52_vm15, %vm58_vm0  ;;  %v206_v63 = vsub.s32 0, %v1101_v62  ;;  %v431_v45 = vsub.s32 3, %v1101_v62 }
  0x8e   :  { %v71_v5 = vpop.permute.xlu0 %70  ;;  %v48_v11 = vadd.f32 %v509_v10, %v508_v8  ;;  %v510_v14 = vsel %vm59_vm3, 1.0, %v856_v43  ;;  %v188_v10 = vld [vmem:[%s1184_s2 + $0x188] sm:$0xff] }
  0x8f   :  { %v65_v0 = vpop.permute.xlu1 %64  ;;  %vm72_vm1 = vcmp.eq.s32.totalorder %v71_v5, 1 }
  0x90   :  { %vm66_vm2 = vcmp.eq.s32.totalorder %v65_v0, %v18_v4  ;;  %v62_v16 = vadd.f32 %v510_v14, %v48_v11  ;;  %v1107_v0 = vld [vmem:[%s1185_s3] sm:$0xff] }
  0x91   :  { %vm73_vm5 = vmand %vm66_vm2, %vm72_vm1  ;;  %v207_v2 = vrot.slane %v1107_v0, %v206_v63  ;;  %v191_v14 = vld [vmem:[%s1184_s2 + $0x1a0] sm:$0xff] }
  0x92   :  { %v511_v17 = vsel %vm73_vm5, 1.0, %v856_v43 }
  0x93   :  { %v93_v7 = vpop.permute.xlu0 %92  ;;  %v76_v20 = vadd.f32 %v511_v17, %v62_v16  ;;  %v192_v16 = vld [vmem:[%s1184_s2 + $0x1a8] sm:$0xff] }
  0x94   :  { %v79_v3 = vpop.permute.xlu1 %78  ;;  %vm94_vm7 = vcmp.eq.s32.totalorder %v93_v7, %v18_v4  ;;  %v186_v7 = vld [vmem:[%s1184_s2 + $0x178] sm:$0xff]  ;;  %v803_v17 = vpack.c.bf16 %v192_v16, %v191_v14 }
  0x95   :  { %vm80_vm6 = vcmp.eq.s32.totalorder %v79_v3, %v18_v4  ;;  %v794_v8 = vpack.c.bf16 %v186_v7, %v185_v1 }
  0x98   :  { %v113_v12 = vpop.permute.xlu0 %112 }
  0x99   :  { %v85_v6 = vpop.permute.xlu1 %84  ;;  %vm114_vm11 = vcmp.eq.s32.totalorder %v113_v12, 1  ;;  %v190_v12 = vld [vmem:[%s1184_s2 + $0x198] sm:$0xff] }
  0x9a   :  { %vm86_vm4 = vcmp.eq.s32.totalorder %v85_v6, 1 }
  0x9b   :  { %vm87_vm10 = vmand %vm80_vm6, %vm86_vm4 }
  0x9c   :  { %v512_v18 = vsel %vm87_vm10, 1.0, %v856_v43 }
  0x9d   :  { %v99_v9 = vpop.permute.xlu1 %98  ;;  %v90_v22 = vadd.f32 %v512_v18, %v76_v20  ;;  %v136_v28 = vpop.permute.xlu0 %135  ;;  %v193_v18 = vld [vmem:[%s1184_s2 + $0x1b0] sm:$0xff] }
  0x9e   :  { %vm100_vm9 = vcmp.eq.s32.totalorder %v99_v9, 1  ;;  %v187_v9 = vld [vmem:[%s1184_s2 + $0x180] sm:$0xff] }
  0x9f   :  { %vm101_vm13 = vmand %vm94_vm7, %vm100_vm9  ;;  %v797_v11 = vpack.c.bf16 %v188_v10, %v187_v9 }
  0xa0   :  { %v513_v21 = vsel %vm101_vm13, 1.0, %v856_v43 }
  0xa1   :  { %v104_v24 = vadd.f32 %v513_v21, %v90_v22  ;;  %v195_v21 = vld [vmem:[%s1184_s2 + $0x1c0] sm:$0xff]  ;;  %v196_v22 = vld [vmem:[%s1184_s2 + $0x1c8] sm:$0xff] }
  0xa2   :  { %v107_v13 = vpop.permute.xlu1 %106 }
  0xa3   :  { %vm108_vm12 = vcmp.eq.s32.totalorder %v107_v13, %v18_v4 }
  0xa4   :  { %vm115_vm14 = vmand %vm108_vm12, %vm114_vm11 }
  0xa5   :  { %v514_v23 = vsel %vm115_vm14, 1.0, %v856_v43 }
  0xa6   :  { %v118_v26 = vadd.f32 %v514_v23, %v104_v24  ;;  %v809_v23 = vpack.c.bf16 %v196_v22, %v195_v21  ;;  %v197_v24 = vld [vmem:[%s1184_s2 + $0x1d0] sm:$0xff] }
  0xa7   :  { %v121_v19 = vpop.permute.xlu1 %120 }
  0xa8   :  { %vm122_vm15 = vcmp.eq.s32.totalorder %v121_v19, %v18_v4  ;;  %v194_v19 = vld [vmem:[%s1184_s2 + $0x1b8] sm:$0xff] }
  0xa9   :  { %v806_v20 = vpack.c.bf16 %v194_v19, %v193_v18 }
  0xac   :  { %v127_v25 = vpop.permute.xlu1 %126 }
  0xad   :  { %vm128_vm0 = vcmp.eq.s32.totalorder %v127_v25, 1  ;;  %v198_v25 = vld [vmem:[%s1184_s2 + $0x1d8] sm:$0xff] }
  0xae   :  { %vm129_vm1 = vmand %vm122_vm15, %vm128_vm0 }
  0xaf   :  { %v515_v27 = vsel %vm129_vm1, 1.0, %v856_v43 }
  0xb0   :  { %v132_v29 = vadd.f32 %v515_v27, %v118_v26  ;;  %v812_v26 = vpack.c.bf16 %v198_v25, %v197_v24  ;;  %v199_v27 = vld [vmem:[%s1184_s2 + $0x1e0] sm:$0xff] }
  0xb2   :  { %v138_v30 = vmul.f32 %v136_v28, %v132_v29  ;;  %v200_v28 = vld [vmem:[%s1184_s2 + $0x1e8] sm:$0xff] }
  0xb3   :  { %v815_v29 = vpack.c.bf16 %v200_v28, %v199_v27 }
  0xb4   :  { %617 = vmatmul.mubr.f32.vlgmr.msra.gmra.mrb[0].mxu0 %v138_v30  ;;  %v281_v30 = vsub.s32 1, %v1101_v62 }
  0xb5   :  { %686 = vmatprep.mubr.msk.f32.mxu0 %vm855_vm8, %v856_v43  ;;  %774 = vmatpush3.bf16.msra.mxu0 %v773_v44 }
  0xb6   :  { %775 = vmatprep.subr.bf16.mxu0 %v852_v15  ;;  %v282_v31 = vrot.slane %v1107_v0, %v281_v30 }
  0xb9   :  { %777 = vmatpush3.bf16.msra.mxu0 %v776_v46  ;;  %v432_v46 = vrot.slane %v1107_v0, %v431_v45 }
  0xba   :  { %778 = vmatprep.subr.bf16.mxu0 %v852_v15 }
  0xbd   :  { %780 = vmatpush3.bf16.msra.mxu0 %v779_v49 }
  0xbe   :  { %781 = vmatprep.subr.bf16.mxu0 %v852_v15 }
  0xc1   :  { %783 = vmatpush3.bf16.msra.mxu0 %v782_v52 }
  0xc2   :  { %784 = vmatprep.subr.bf16.mxu0 %v852_v15 }
  0xc5   :  { %786 = vmatpush3.bf16.msra.mxu0 %v785_v55 }
  0xc6   :  { %787 = vmatprep.subr.bf16.mxu0 %v852_v15 }
  0xc9   :  { %789 = vmatpush3.bf16.msra.mxu0 %v788_v58 }
  0xca   :  { %790 = vmatprep.subr.bf16.mxu0 %v852_v15 }
  0xcd   :  { %792 = vmatpush3.bf16.msra.mxu0 %v791_v61 }
  0xce   :  { %793 = vmatprep.subr.bf16.mxu0 %v852_v15 }
  0xd1   :  { %795 = vmatpush3.bf16.msra.mxu0 %v794_v8 }
 0x187   :  { %v274_v3 = vpop.f32.mrb[0].mxu0 }
 0x188   :  { %v275_v4 = vadd.f32 %v274_v3, %v207_v2  ;;  %v618_v5 = vpop.f32.mrb[1].mxu0 }
 0x18a   :  { %844 = vtanh.f32 %v275_v4 }
 0x194   :  { %v845_v6 = vpop.eup %844 }
 0x195   :  { %652 = vmatmul.mubr.f32.vlgmr.msra.gmra.mrb[0].mxu1 %v845_v6 }
 0x196   :  { %721 = vmatprep.mubr.msk.f32.mxu1 %vm855_vm8, %v856_v43  ;;  %v189_v43 = vld [vmem:[%s1184_s2 + $0x190] sm:$0xff]  ;;  %798 = vmatpush3.bf16.msra.mxu1 %v797_v11 }
 0x197   :  { %v800_v13 = vpack.c.bf16 %v190_v12, %v189_v43  ;;  %799 = vmatprep.subr.bf16.mxu1 %v852_v15 }
 0x19a   :  { %801 = vmatpush3.bf16.msra.mxu1 %v800_v13 }
 0x19b   :  { %802 = vmatprep.subr.bf16.mxu1 %v852_v15 }
 0x19e   :  { %804 = vmatpush3.bf16.msra.mxu1 %v803_v17 }
 0x19f   :  { %805 = vmatprep.subr.bf16.mxu1 %v852_v15 }
 0x1a2   :  { %807 = vmatpush3.bf16.msra.mxu1 %v806_v20 }
 0x1a3   :  { %808 = vmatprep.subr.bf16.mxu1 %v852_v15 }
 0x1a6   :  { %810 = vmatpush3.bf16.msra.mxu1 %v809_v23 }
 0x1a7   :  { %811 = vmatprep.subr.bf16.mxu1 %v852_v15 }
 0x1aa   :  { %813 = vmatpush3.bf16.msra.mxu1 %v812_v26 }
 0x1ab   :  { %814 = vmatprep.subr.bf16.mxu1 %v852_v15 }
 0x1ae   :  { %816 = vmatpush3.bf16.msra.mxu1 %v815_v29 }
 0x1af   :  { %817 = vmatprep.subr.bf16.mxu1 %v852_v15  ;;  %v356_v15 = vsub.s32 2, %v1101_v62 }
 0x1b1   :  { %v357_v39 = vrot.slane %v1107_v0, %v356_v15 }
 0x1b2   :  { %819 = vmatpush3.bf16.msra.mxu1 %v818_v38 }
 0x268   :  { %v349_v32 = vpop.f32.mrb[0].mxu1 }
 0x269   :  { %v350_v33 = vadd.f32 %v349_v32, %v282_v31  ;;  %v653_v34 = vpop.f32.mrb[1].mxu1 }
 0x26b   :  { %v353_v35 = vmax.f32 %v350_v33, 0.0 }
 0x26d   :  { %687 = vmatmul.mubr.f32.vlgmr.msra.gmra.mrb[2].mxu0 %v353_v35 }
 0x340   :  { %v424_v40 = vpop.f32.mrb[2].mxu0 }
 0x341   :  { %v425_v41 = vadd.f32 %v424_v40, %v357_v39  ;;  %v688_v42 = vpop.f32.mrb[3].mxu0 }
 0x343   :  { %v428_v44 = vmax.f32 %v425_v41, 0.0 }
 0x345   :  { %722 = vmatmul.mubr.f32.vlgmr.msra.gmra.mrb[2].mxu1 %v428_v44 }
 0x418   :  { %v499_v47 = vpop.f32.mrb[2].mxu1 }
 0x419   :  { %v500_v48 = vadd.f32 %v499_v47, %v432_v46  ;;  %v723_v49 = vpop.f32.mrb[3].mxu1 }
 0x41b   :  { %503 = vst [vmem:[%s1186_s4] sm:$0xff] %v500_v48 }

</bundles_post_ra>
